<compile_context>
chip_gen: v7x
topology: tpu7x:2x2x1
jax: 0.10.0
libtpu: 0.0.40
codegen_flags: <defaults>
</compile_context>

<pallas_src>
import jax
import jax.numpy as jnp
from jax import lax
from jax.experimental import pallas as pl
from jax.experimental.pallas import tpu as pltpu

NEG_SLOPE = 0.01
LN_EPS = 1e-5


def _leaky_relu(x):
    return jnp.where(x >= 0, x, NEG_SLOPE * x)


def _layer_norm(x):
    # Two-pass LayerNorm (torch parity): mean, centered biased variance, rsqrt (EUP slot).
    m = jnp.mean(x, axis=-1, keepdims=True)
    c = x - m
    v = jnp.mean(c * c, axis=-1, keepdims=True)
    return c * lax.rsqrt(v + LN_EPS)


def _make_kernel(compute_dtype):
    def kernel(x_ref, w1_ref, b1_ref, w2_ref, b2_ref, w3_ref, b3_ref, o_ref):
        tm = x_ref.shape[0]

        # In-kernel cast of the activation tile (VPU op on resident data; saves an HBM pass
        # vs. casting x in the wrapper).
        x = x_ref[...].astype(compute_dtype)

        # Layer 0: Linear -> LayerNorm -> LeakyReLU  (MXU, f32 accumulate)
        h = jnp.dot(x, w1_ref[...], preferred_element_type=jnp.float32) + b1_ref[...]
        h = _leaky_relu(_layer_norm(h))

        # Layer 1: Linear -> LayerNorm -> LeakyReLU  (MXU, f32 accumulate)
        h = jnp.dot(h.astype(compute_dtype), w2_ref[...],
                    preferred_element_type=jnp.float32) + b2_ref[...]
        h = _leaky_relu(_layer_norm(h))

        # Output head: Linear(n_hidden, 1) -> LeakyReLU as VPU mul + XLU lane reduce
        # (avoids a 1-column MXU matmul); b3 is a scalar read from SMEM.
        y = jnp.sum(h * w3_ref[...], axis=-1, keepdims=True) + b3_ref[0]   # (tm, 1) f32
        # Lane-dense store: one (1, 1, tm) row per tile instead of a lane-sparse (tm, 1).
        o_ref[...] = _leaky_relu(y).reshape(1, 1, tm).astype(o_ref.dtype)

    return kernel


def _pick_tm(N, n_input, max_tm=2048):
    """Batch-tile heuristic: >= 2 tiles (v7x dual TC), large enough to amortize per-step
    overhead, capped so the double-buffered x tile stays ~<= 8 MiB for big n_input."""
    tm = min(max_tm, pl.cdiv(N, 2))
    tm = max(8, pl.cdiv(tm, 8) * 8)
    rows_cap = max(8, (((8 << 20) // max(4 * n_input, 1)) // 8) * 8)
    return min(tm, rows_cap)


def library_size_encoder(x, params, *, tm=None, use_bf16=True):
    """x: (N, n_input) f32. params: dict of w1 (in,h), b1 (1,h), w2 (h,h), b2 (1,h),
    w3 (h,1), b3 (1,1).

    use_bf16=True runs both matmuls with bf16 operands + f32 accumulation (bf16-native MXU);
    set False for strict f32 parity with the torch reference.
    """
    N, n_input = x.shape
    n_hidden = params["w1"].shape[1]
    if tm is None:
        tm = _pick_tm(N, n_input)
    assert tm % 8 == 0, "tm must be a multiple of the 8-row sublane tile"
    n_tiles = pl.cdiv(N, tm)

    compute_dtype = jnp.bfloat16 if use_bf16 else jnp.float32
    # Only the small weight matrices are cast outside the kernel.
    w1 = params["w1"].astype(compute_dtype)
    w2 = params["w2"].astype(compute_dtype)
    b1, b2 = params["b1"], params["b2"]
    w3_row = params["w3"].reshape(1, n_hidden)          # lane-major row for the VPU head
    b3 = params["b3"].reshape(1).astype(jnp.float32)    # scalar, lives in SMEM

    full = lambda shape: pl.BlockSpec(shape, lambda i: (0, 0))  # resident weight blocks

    out = pl.pallas_call(
        _make_kernel(compute_dtype),
        out_shape=jax.ShapeDtypeStruct((n_tiles, 1, tm), jnp.float32),
        grid_spec=pltpu.PrefetchScalarGridSpec(
            num_scalar_prefetch=0,
            grid=(n_tiles,),
            in_specs=[
                pl.BlockSpec((tm, n_input), lambda i: (i, 0)),        # x tile (ragged tail ok)
                full((n_input, n_hidden)),                            # w1
                full((1, n_hidden)),                                  # b1
                full((n_hidden, n_hidden)),                           # w2
                full((1, n_hidden)),                                  # b2
                full((1, n_hidden)),                                  # w3 row
                pl.BlockSpec(memory_space=pltpu.MemorySpace.SMEM),    # b3 scalar
            ],
            out_specs=pl.BlockSpec((1, 1, tm), lambda i: (i, 0, 0)),  # lane-dense output
        ),
        compiler_params=pltpu.CompilerParams(
            dimension_semantics=("parallel",)),   # batch tiles shard across TCs on v7x
    )(x, w1, b1, w2, b2, w3_row, b3)

    # Tiny output: flatten, drop rows past N (garbage from the ragged last tile), reshape.
    return out.reshape(n_tiles * tm)[:N].reshape(N, 1)


def _reference(x, p, compute_dtype=jnp.float32):
    def ln(h):
        m = jnp.mean(h, axis=-1, keepdims=True)
        v = jnp.mean((h - m) ** 2, axis=-1, keepdims=True)
        return (h - m) * lax.rsqrt(v + LN_EPS)

    hi = lax.Precision.HIGHEST
    h = jnp.dot(x.astype(compute_dtype), p["w1"].astype(compute_dtype),
                preferred_element_type=jnp.float32, precision=hi) + p["b1"]
    h = _leaky_relu(ln(h))
    h = jnp.dot(h.astype(compute_dtype), p["w2"].astype(compute_dtype),
                preferred_element_type=jnp.float32, precision=hi) + p["b2"]
    h = _leaky_relu(ln(h))
    y = jnp.sum(h * p["w3"].reshape(1, -1), axis=-1, keepdims=True) + p["b3"]
    return _leaky_relu(y)


def _init_params(key, n_input, n_hidden):
    ks = jax.random.split(key, 6)
    # Deterministic synthetic init (PyTorch-style uniform fan-in scaling).
    def unif(k, shape, fan_in):
        bound = 1.0 / jnp.sqrt(fan_in)
        return jax.random.uniform(k, shape, jnp.float32, -bound, bound)
    return {
        "w1": unif(ks[0], (n_input, n_hidden), n_input),
        "b1": unif(ks[1], (1, n_hidden), n_input),
        "w2": unif(ks[2], (n_hidden, n_hidden), n_hidden),
        "b2": unif(ks[3], (1, n_hidden), n_hidden),
        "w3": unif(ks[4], (n_hidden, 1), n_hidden),
        "b3": unif(ks[5], (1, 1), n_hidden),
    }


if __name__ == "__main__":
    key = jax.random.PRNGKey(0)
    k_x, k_p = jax.random.split(key)

    N, n_input, n_hidden = 16, 32, 128
    x = jax.random.normal(k_x, (N, n_input), jnp.float32)
    params = _init_params(k_p, n_input, n_hidden)

    # Default path: bf16 MXU operands, f32 accumulation. _pick_tm gives tm=8 -> 2 tiles here.
    out = jax.block_until_ready(library_size_encoder(x, params))
    assert out.shape == (N, 1)
    ref_bf16 = _reference(x, params, compute_dtype=jnp.bfloat16)
    assert jnp.allclose(out, ref_bf16, atol=1e-3, rtol=1e-3), (
        f"bf16 path: max abs err {jnp.max(jnp.abs(out - ref_bf16))}")

    # Strict f32 parity path.
    out_f32 = jax.block_until_ready(library_size_encoder(x, params, use_bf16=False))
    ref_f32 = _reference(x, params, compute_dtype=jnp.float32)
    assert jnp.allclose(out_f32, ref_f32, atol=1e-4, rtol=1e-4), (
        f"f32 path: max abs err {jnp.max(jnp.abs(out_f32 - ref_f32))}")

    print("KERNEL_OK")
</pallas_src>

<mosaic_0001>
module attributes {stable_mosaic.version = 11 : i64} {
  func.func @kernel(%arg0: i32, %arg1: memref<8x32xf32, #tpu.memory_space<vmem>>, %arg2: memref<32x128xbf16, #tpu.memory_space<vmem>>, %arg3: memref<1x128xf32, #tpu.memory_space<vmem>>, %arg4: memref<128x128xbf16, #tpu.memory_space<vmem>>, %arg5: memref<1x128xf32, #tpu.memory_space<vmem>>, %arg6: memref<1x128xf32, #tpu.memory_space<vmem>>, %arg7: memref<1xf32, #tpu.memory_space<smem>>, %arg8: memref<1x1x8xf32, #tpu.memory_space<vmem>>) attributes {dimension_semantics = [#tpu.dimension_semantics<parallel>], iteration_bounds = array<i64: 2>, scalar_prefetch = 0 : i64, scratch_operands = 0 : i64, tpu.core_type = #tpu.core_type<tc>, window_params = [{transform_indices = @transform_0, window_bounds = array<i64: 8, 32>}, {pipeline_mode = #tpu.pipeline_mode<synchronous>, transform_indices = @transform_1, window_bounds = array<i64: 32, 128>}, {pipeline_mode = #tpu.pipeline_mode<synchronous>, transform_indices = @transform_2, window_bounds = array<i64: 1, 128>}, {pipeline_mode = #tpu.pipeline_mode<synchronous>, transform_indices = @transform_3, window_bounds = array<i64: 128, 128>}, {pipeline_mode = #tpu.pipeline_mode<synchronous>, transform_indices = @transform_4, window_bounds = array<i64: 1, 128>}, {pipeline_mode = #tpu.pipeline_mode<synchronous>, transform_indices = @transform_5, window_bounds = array<i64: 1, 128>}, {transform_indices = @transform_6, window_bounds = array<i64: 1>}, {transform_indices = @transform_7, window_bounds = array<i64: 1, 1, 8>}]} {
    %c0 = arith.constant 0 : index
    %c0_0 = arith.constant 0 : index
    %0 = vector.load %arg1[%c0, %c0_0] : memref<8x32xf32, #tpu.memory_space<vmem>>, vector<8x32xf32>
    %1 = arith.truncf %0 : vector<8x32xf32> to vector<8x32xbf16>
    %c0_1 = arith.constant 0 : index
    %c0_2 = arith.constant 0 : index
    %2 = vector.load %arg2[%c0_1, %c0_2] : memref<32x128xbf16, #tpu.memory_space<vmem>>, vector<32x128xbf16>
    %cst = arith.constant dense<0.000000e+00> : vector<8x128xf32>
    %3 = tpu.matmul %1, %2, %cst {dimension_numbers = #tpu.dot_dimension_numbers<[1], [0], [0], [1], [0, 0, 1, 1], [], []>} : vector<8x32xbf16>, vector<32x128xbf16>, vector<8x128xf32> -> vector<8x128xf32>
    %c0_3 = arith.constant 0 : index
    %c0_4 = arith.constant 0 : index
    %4 = vector.load %arg3[%c0_3, %c0_4] : memref<1x128xf32, #tpu.memory_space<vmem>>, vector<1x128xf32>
    %5 = vector.broadcast %4 : vector<1x128xf32> to vector<8x128xf32>
    %6 = arith.addf %3, %5 : vector<8x128xf32>
    %cst_5 = arith.constant dense<0.000000e+00> : vector<8xf32>
    %7 = vector.multi_reduction <add>, %6, %cst_5 [1] : vector<8x128xf32> to vector<8xf32>
    %8 = vector.shape_cast %7 : vector<8xf32> to vector<8x1xf32>
    %cst_6 = arith.constant 1.280000e+02 : f32
    %9 = vector.broadcast %cst_6 : f32 to vector<8x1xf32>
    %10 = arith.divf %8, %9 : vector<8x1xf32>
    %11 = vector.broadcast %10 : vector<8x1xf32> to vector<8x128xf32>
    %12 = arith.subf %6, %11 : vector<8x128xf32>
    %13 = arith.mulf %12, %12 : vector<8x128xf32>
    %cst_7 = arith.constant dense<0.000000e+00> : vector<8xf32>
    %14 = vector.multi_reduction <add>, %13, %cst_7 [1] : vector<8x128xf32> to vector<8xf32>
    %15 = vector.shape_cast %14 : vector<8xf32> to vector<8x1xf32>
    %cst_8 = arith.constant 1.280000e+02 : f32
    %16 = vector.broadcast %cst_8 : f32 to vector<8x1xf32>
    %17 = arith.divf %15, %16 : vector<8x1xf32>
    %cst_9 = arith.constant 9.99999974E-6 : f32
    %18 = vector.broadcast %cst_9 : f32 to vector<8x1xf32>
    %19 = arith.addf %17, %18 : vector<8x1xf32>
    %20 = math.rsqrt %19 : vector<8x1xf32>
    %21 = vector.broadcast %20 : vector<8x1xf32> to vector<8x128xf32>
    %22 = arith.mulf %12, %21 : vector<8x128xf32>
    %cst_10 = arith.constant 0.000000e+00 : f32
    %23 = vector.broadcast %cst_10 : f32 to vector<8x128xf32>
    %24 = arith.cmpf oge, %22, %23 : vector<8x128xf32>
    %cst_11 = arith.constant 0.00999999977 : f32
    %25 = vector.broadcast %cst_11 : f32 to vector<8x128xf32>
    %26 = arith.mulf %25, %22 : vector<8x128xf32>
    %27 = arith.select %24, %22, %26 : vector<8x128xi1>, vector<8x128xf32>
    %28 = arith.truncf %27 : vector<8x128xf32> to vector<8x128xbf16>
    %c0_12 = arith.constant 0 : index
    %c0_13 = arith.constant 0 : index
    %29 = vector.load %arg4[%c0_12, %c0_13] : memref<128x128xbf16, #tpu.memory_space<vmem>>, vector<128x128xbf16>
    %cst_14 = arith.constant dense<0.000000e+00> : vector<8x128xf32>
    %30 = tpu.matmul %28, %29, %cst_14 {dimension_numbers = #tpu.dot_dimension_numbers<[1], [0], [0], [1], [0, 0, 1, 1], [], []>} : vector<8x128xbf16>, vector<128x128xbf16>, vector<8x128xf32> -> vector<8x128xf32>
    %c0_15 = arith.constant 0 : index
    %c0_16 = arith.constant 0 : index
    %31 = vector.load %arg5[%c0_15, %c0_16] : memref<1x128xf32, #tpu.memory_space<vmem>>, vector<1x128xf32>
    %32 = vector.broadcast %31 : vector<1x128xf32> to vector<8x128xf32>
    %33 = arith.addf %30, %32 : vector<8x128xf32>
    %cst_17 = arith.constant dense<0.000000e+00> : vector<8xf32>
    %34 = vector.multi_reduction <add>, %33, %cst_17 [1] : vector<8x128xf32> to vector<8xf32>
    %35 = vector.shape_cast %34 : vector<8xf32> to vector<8x1xf32>
    %cst_18 = arith.constant 1.280000e+02 : f32
    %36 = vector.broadcast %cst_18 : f32 to vector<8x1xf32>
    %37 = arith.divf %35, %36 : vector<8x1xf32>
    %38 = vector.broadcast %37 : vector<8x1xf32> to vector<8x128xf32>
    %39 = arith.subf %33, %38 : vector<8x128xf32>
    %40 = arith.mulf %39, %39 : vector<8x128xf32>
    %cst_19 = arith.constant dense<0.000000e+00> : vector<8xf32>
    %41 = vector.multi_reduction <add>, %40, %cst_19 [1] : vector<8x128xf32> to vector<8xf32>
    %42 = vector.shape_cast %41 : vector<8xf32> to vector<8x1xf32>
    %cst_20 = arith.constant 1.280000e+02 : f32
    %43 = vector.broadcast %cst_20 : f32 to vector<8x1xf32>
    %44 = arith.divf %42, %43 : vector<8x1xf32>
    %cst_21 = arith.constant 9.99999974E-6 : f32
    %45 = vector.broadcast %cst_21 : f32 to vector<8x1xf32>
    %46 = arith.addf %44, %45 : vector<8x1xf32>
    %47 = math.rsqrt %46 : vector<8x1xf32>
    %48 = vector.broadcast %47 : vector<8x1xf32> to vector<8x128xf32>
    %49 = arith.mulf %39, %48 : vector<8x128xf32>
    %cst_22 = arith.constant 0.000000e+00 : f32
    %50 = vector.broadcast %cst_22 : f32 to vector<8x128xf32>
    %51 = arith.cmpf oge, %49, %50 : vector<8x128xf32>
    %cst_23 = arith.constant 0.00999999977 : f32
    %52 = vector.broadcast %cst_23 : f32 to vector<8x128xf32>
    %53 = arith.mulf %52, %49 : vector<8x128xf32>
    %54 = arith.select %51, %49, %53 : vector<8x128xi1>, vector<8x128xf32>
    %c0_24 = arith.constant 0 : index
    %c0_25 = arith.constant 0 : index
    %55 = vector.load %arg6[%c0_24, %c0_25] : memref<1x128xf32, #tpu.memory_space<vmem>>, vector<1x128xf32>
    %56 = vector.broadcast %55 : vector<1x128xf32> to vector<8x128xf32>
    %57 = arith.mulf %54, %56 : vector<8x128xf32>
    %cst_26 = arith.constant dense<0.000000e+00> : vector<8xf32>
    %58 = vector.multi_reduction <add>, %57, %cst_26 [1] : vector<8x128xf32> to vector<8xf32>
    %59 = vector.shape_cast %58 : vector<8xf32> to vector<8x1xf32>
    %c0_27 = arith.constant 0 : index
    %60 = memref.load %arg7[%c0_27] : memref<1xf32, #tpu.memory_space<smem>>
    %61 = vector.broadcast %60 : f32 to vector<8x1xf32>
    %62 = arith.addf %59, %61 : vector<8x1xf32>
    %cst_28 = arith.constant 0.000000e+00 : f32
    %63 = vector.broadcast %cst_28 : f32 to vector<8x1xf32>
    %64 = arith.cmpf oge, %62, %63 : vector<8x1xf32>
    %cst_29 = arith.constant 0.00999999977 : f32
    %65 = vector.broadcast %cst_29 : f32 to vector<8x1xf32>
    %66 = arith.mulf %65, %62 : vector<8x1xf32>
    %67 = arith.select %64, %62, %66 : vector<8x1xi1>, vector<8x1xf32>
    %68 = vector.shape_cast %67 : vector<8x1xf32> to vector<1x1x8xf32>
    %c0_30 = arith.constant 0 : index
    %c0_31 = arith.constant 0 : index
    %c0_32 = arith.constant 0 : index
    %69 = vector.load %arg8[%c0_30, %c0_31, %c0_32] : memref<1x1x8xf32, #tpu.memory_space<vmem>>, vector<1x1x8xf32>
    tpu.vector_store %arg8[%c0_30, %c0_31, %c0_32], %68 {strides = array<i32>} : memref<1x1x8xf32, #tpu.memory_space<vmem>>, vector<1x1x8xf32>,
    return
  }
  func.func @transform_0(%arg0: i32) -> (i32, i32) {
    %c0_i32 = arith.constant 0 : i32
    %c0_i32_0 = arith.constant 0 : i32
    return %arg0, %c0_i32 : i32, i32
  }
  func.func @transform_1(%arg0: i32) -> (i32, i32) {
    %c0_i32 = arith.constant 0 : i32
    %c0_i32_0 = arith.constant 0 : i32
    %c0_i32_1 = arith.constant 0 : i32
    return %c0_i32, %c0_i32_0 : i32, i32
  }
  func.func @transform_2(%arg0: i32) -> (i32, i32) {
    %c0_i32 = arith.constant 0 : i32
    %c0_i32_0 = arith.constant 0 : i32
    %c0_i32_1 = arith.constant 0 : i32
    return %c0_i32, %c0_i32_0 : i32, i32
  }
  func.func @transform_3(%arg0: i32) -> (i32, i32) {
    %c0_i32 = arith.constant 0 : i32
    %c0_i32_0 = arith.constant 0 : i32
    %c0_i32_1 = arith.constant 0 : i32
    return %c0_i32, %c0_i32_0 : i32, i32
  }
  func.func @transform_4(%arg0: i32) -> (i32, i32) {
    %c0_i32 = arith.constant 0 : i32
    %c0_i32_0 = arith.constant 0 : i32
    %c0_i32_1 = arith.constant 0 : i32
    return %c0_i32, %c0_i32_0 : i32, i32
  }
  func.func @transform_5(%arg0: i32) -> (i32, i32) {
    %c0_i32 = arith.constant 0 : i32
    %c0_i32_0 = arith.constant 0 : i32
    %c0_i32_1 = arith.constant 0 : i32
    return %c0_i32, %c0_i32_0 : i32, i32
  }
  func.func @transform_6(%arg0: i32) -> i32 {
    %c0_i32 = arith.constant 0 : i32
    %c0_i32_0 = arith.constant 0 : i32
    return %c0_i32 : i32
  }
  func.func @transform_7(%arg0: i32) -> (i32, i32, i32) {
    %c0_i32 = arith.constant 0 : i32
    %c0_i32_0 = arith.constant 0 : i32
    %c0_i32_1 = arith.constant 0 : i32
    return %arg0, %c0_i32, %c0_i32_0 : i32, i32, i32
  }
}

</mosaic_0001>

<bundles_post_ra>
// kernel: tpu_custom_call.1
= control target key start
LH: loop header
LB: loop body
LE: loop exit
PB: predicated region body
PF: predicated region fallthrough
CT: control target
= control target key end

     0   :  { %s1259_s0 = inlined_call_operand.hbm [shape: f32[16,32], index: 0, kind: input, shape index: {}]   ;;  %s1260_s1 = inlined_call_operand.hbm [shape: bf16[32,128], index: 1, kind: input, shape index: {}]   ;;  %s1261_s2 = inlined_call_operand.vmem [shape: f32[1,128], index: 2, kind: input, shape index: {}]   ;;  %s1262_s3 = inlined_call_operand.hbm [shape: bf16[128,128], index: 3, kind: input, shape index: {}]   ;;  %s1263_s4 = inlined_call_operand.vmem [shape: f32[1,128], index: 4, kind: input, shape index: {}]   ;;  %s1264_s5 = inlined_call_operand.vmem [shape: f32[1,128], index: 5, kind: input, shape index: {}]   ;;  %s1265_s6 = inlined_call_operand.<no memory space> [shape: f32[1], index: 6, kind: input, shape index: {}]   ;;  %s1266_s7 = inlined_call_operand.hbm [shape: f32[2,1,8], index: 7, kind: output, shape index: {}]  }
   0x1   :  { %12 = sst [smem:[#allocation2]] %s1265_s6 }
   0x2   :  { %13 = vsyncpa [#allocation4], 0 }
   0x3   :  { %15 = vsyncpa [#allocation4 + $0x1], 0 }
   0x4   :  { %16 = vsyncpa [#allocation7], 0 }
   0x5   :  { %17 = vsyncpa [#allocation5], 0 }
   0x6   :  { %19 = vsyncpa [#allocation5 + $0x1], 0  ;;  %s1020_s26 = smov 0   ;;  %s1022_s27 = smov 0  }
   0x7   :  { %s1024_s28 = smov 0   ;;  %s1026_s29 = smov 0  }
   0x8 LB: > { %s1041_s6 = sadd.s32 4294967295, %s967_s29   ;;  %s658_s30 = sadd.s32 4294967294, %s967_s29   ;;  %s967_s29 = sphi %s1026_s29, %s1286_s29   ;;  %s963_s28 = sphi %s1024_s28, %s1285_s28   ;;  %s959_s27 = sphi %s1022_s27, %s1284_s27   ;;  %s955_s26 = sphi %s1020_s26, %s1283_s26  }
   0x9   : > { %p45_p0 = scmp.ne.s32.totalorder %s959_s27, %s955_s26  ;;  %p1267_p1 = scmp.eq.s32.totalorder %s1041_s6, 0 }
   0xa   : > { %p201_p3 = scmp.eq.s32.totalorder %s658_s30, 1  ;;  %p659_p5 = scmp.ge.s32.totalorder %s967_s29, 1 }
   0xb   : > { %p1050_p4 = por %p1267_p1, %p45_p0  ;;  %p208_p7 = scmp.lt.s32.totalorder %s967_s29, 3 }
   0xc   : > { %p1055_p6 = por %p201_p3, %p45_p0  ;;  %s969_s11 = smov [#allocation6]  }
   0xd   : > { %s1270_s8 = scalar_select %p1050_p4, 1, 0 }
   0xe   : > { %s1271_s9 = scalar_select %p1055_p6, 1, 0 }
   0xf   : > { %p1060_p8 = pnand %p659_p5, %p208_p7  ;;  %s220_s12 = sshll.u32 %s969_s11, 4  ;;  %s1064_s12 = int_to_ptr.vmem [resolvable:$true] %s220_s12 }
  0x10   : > { %s970_s14 = smov [#allocation8]   ;;  %s811_s18 = scalar_lea.hbm %s1260_s1, 256 }
  0x11   : > { %p738_p9 = pneg %p1060_p8  ;;  %s236_s15 = sshll.u32 %s970_s14, 4  ;;  %s1075_s15 = int_to_ptr.vmem [resolvable:$true] %s236_s15 }
  0x12   : > { %p812_p12 = scmp.ne.s32.totalorder %s1260_s1, %s811_s18  ;;  %p818_p5 = scmp.lt.u32.totalorder %s811_s18, %s1260_s1 }
  0x13   : > { %p1071_p11 = pnand %p738_p9, %p1267_p1 }
  0x15   : > { %p813_p13 = pneg %p1071_p11 }
  0x17   : > { %p814_p0 = pnand %p813_p13, %p812_p12 }
  0x19   : > { %p815_p3 = pneg %p814_p0 }
  0x1b   : > { %p820_p7 = pnand %p818_p5, %p815_p3 }
  0x1d   : > { %823 = shalt.err (!%p820_p7)
}
  0x1e   : > { %s824_s23 = scalar_lea.vmem %s1064_s12, 256  ;;  %p832_p2 = scmp.lt.s32.totalorder %s1064_s12, %s1064_s12 }
  0x1f   : > { %p825_p9 = scmp.ne.s32.totalorder %s1064_s12, %s824_s23  ;;  %p833_p12 = scmp.lt.s32.totalorder %s824_s23, %s824_s23 }
  0x21   : > { %p827_p10 = pnand %p825_p9, %p813_p13  ;;  %p834_p0 = por %p833_p12, %p832_p2 }
  0x23   : > { %p828_p1 = pneg %p827_p10 }
  0x25   : > { %p835_p6 = pnand %p834_p0, %p828_p1 }
  0x27   : > { %838 = shalt.err (!%p835_p6)
}
  0x28   : > { %s971_s24 = smov 64   ;;  %s972_s25 = smov 4  }
  0x29   : > { %741 = dma.hbm_to_vmem [thread:$0]  (!%p1071_p11), %s1260_s1, 256, %s1064_s12, [#allocation7], %s971_s24, %s971_s24, %s972_s25  }
  0x2a   : > { %s839_s17 = scalar_lea.hbm %s1262_s3, 1024 }
  0x2b   : > { %p840_p2 = scmp.ne.s32.totalorder %s1262_s3, %s839_s17  ;;  %p846_p10 = scmp.lt.u32.totalorder %s839_s17, %s1262_s3 }
  0x2d   : > { %p842_p1 = pnand %p840_p2, %p813_p13 }
  0x2f   : > { %p843_p6 = pneg %p842_p1 }
  0x31   : > { %p848_p3 = pnand %p846_p10, %p843_p6 }
  0x33   : > { %851 = shalt.err (!%p848_p3)
}
  0x34   : > { %s852_s12 = scalar_lea.vmem %s1075_s15, 1024  ;;  %p860_p12 = scmp.lt.s32.totalorder %s1075_s15, %s1075_s15 }
  0x35   : > { %p853_p5 = scmp.ne.s32.totalorder %s1075_s15, %s852_s12  ;;  %p861_p0 = scmp.lt.s32.totalorder %s852_s12, %s852_s12 }
  0x37   : > { %p855_p7 = pnand %p853_p5, %p813_p13  ;;  %p862_p2 = por %p861_p0, %p860_p12 }
  0x39   : > { %p856_p9 = pneg %p855_p7 }
  0x3b   : > { %p863_p1 = pnand %p862_p2, %p856_p9 }
  0x3d   : > { %866 = shalt.err (!%p863_p1)
}
  0x3e   : > { %744 = dma.hbm_to_vmem [thread:$0]  (!%p1071_p11), %s1262_s3, 1024, %s1075_s15, [#allocation7], %s971_s24, %s971_s24, %s972_s25  }
  0x3f   : > { %s1130_s30 = sadd.s32 1, %s967_s29   ;;  %s32_s13 = sadd.s32 1, %s963_s28 }
  0x40   : > { %s29_s11 = ssub.s32 %s967_s29, %s1130_s30  ;;  %p39_p13 = scmp.ne.s32.totalorder %s963_s28, %s959_s27 }
  0x41   : > { %p30_p6 = scmp.eq.s32.totalorder %s29_s11, 0  ;;  %p40_p10 = scmp.eq.s32.totalorder %s967_s29, 0 }
  0x42   : > { %p1274_p3 = scmp.eq.s32.totalorder %s1041_s6, 1  ;;  %p755_p7 = scmp.lt.s32.totalorder %s967_s29, 2 }
  0x43   : > { %s1146_s16 = scalar_select %p30_p6, %s963_s28, %s32_s13  }
  0x44   : > { %p1140_p5 = por %p1274_p3, %p39_p13  ;;  %p41_p9 = por %p40_p10, %p39_p13 }
  0x45   : > { %s259_s17 = sand.u32 1, %s963_s28   ;;  %s664_s15 = sshll.u32 %s967_s29, 7 }
  0x46   : > { %s1275_s14 = scalar_select %p1140_p5, 1, 0 }
  0x47   : > { %s663_s18 = sshll.u32 %s259_s17, 3  ;;  %s1153_s19 = scalar_lea.hbm %s1259_s0, %s664_s15 }
  0x48   : > { %s263_s20 = scalar_lea.vmem [#allocation3], %s663_s18  ;;  %p1157_p11 = pnand %p755_p7, %p41_p9 }
  0x49   : > { %s270_s21 = sshll.u32 %s263_s20, 4  ;;  %s260_s22 = scalar_lea.sflag [#allocation4], %s259_s17  ;;  %s1155_s21 = int_to_ptr.vmem [resolvable:$true] %s270_s21 }
  0x4a   : > { %s867_s23 = scalar_lea.hbm %s1153_s19, 128  ;;  %p869_p0 = pneg %p1157_p11 }
  0x4b   : > { %p868_p12 = scmp.ne.s32.totalorder %s1153_s19, %s867_s23  ;;  %s872_s18 = scalar_lea.hbm %s1259_s0, 256 }
  0x4c   : > { %p873_p13 = scmp.lt.u32.totalorder %s1153_s19, %s1259_s0  ;;  %p874_p6 = scmp.lt.u32.totalorder %s872_s18, %s867_s23 }
  0x4d   : > { %p870_p2 = pnand %p869_p0, %p868_p12  ;;  %p876_p3 = scmp.lt.u32.totalorder %s867_s23, %s1153_s19 }
  0x4e   : > { %p875_p10 = por %p874_p6, %p873_p13 }
  0x4f   : > { %p871_p1 = pneg %p870_p2 }
  0x50   : > { %p877_p7 = por %p876_p3, %p875_p10 }
  0x52   : > { %p878_p9 = pnand %p877_p7, %p871_p1 }
  0x54   : > { %881 = shalt.err (!%p878_p9)
}
  0x55   : > { %s882_s17 = scalar_lea.vmem %s1155_s21, 128  ;;  %s973_s25 = smov [#allocation3]  }
  0x56   : > { %p883_p12 = scmp.ne.s32.totalorder %s1155_s21, %s882_s17  ;;  %s887_s20 = sshll.u32 %s973_s25, 4  ;;  %s888_s20 = int_to_ptr.vmem [resolvable:$false] %s887_s20 }
  0x57   : > { %s889_s13 = scalar_lea.vmem %s888_s20, 256  ;;  %p890_p4 = scmp.lt.s32.totalorder %s1155_s21, %s888_s20 }
  0x58   : > { %p885_p2 = pnand %p883_p12, %p869_p0  ;;  %p891_p13 = scmp.lt.s32.totalorder %s889_s13, %s882_s17 }
  0x5a   : > { %p886_p5 = pneg %p885_p2  ;;  %p892_p6 = por %p891_p13, %p890_p4 }
  0x5c   : > { %p893_p10 = pnand %p892_p6, %p886_p5 }
  0x5e   : > { %896 = shalt.err (!%p893_p10)
}
  0x5f   : > { %748 = dma.hbm_to_vmem [thread:$0]  (!%p1157_p11), %s1153_s19, 128, %s1155_s21, %s260_s22  }
  0x60   : > { %279 = sbr.rel (%p1060_p8) target bundleno = 1332 (0x534), region = 48  ;;  %s1189_s23 = sand.u32 (!%p1060_p8), 1, %s959_s27  }
  0x61   : > { %s666_s11 = sshll.u32 (!%p1060_p8), %s1189_s23, 3  ;;  %s282_s18 = scalar_lea.sflag (!%p1060_p8), [#allocation4], %s1189_s23 }
  0x62   : > { %s285_s15 = scalar_lea.vmem (!%p1060_p8), [#allocation3], %s666_s11  ;;  %p1277_p4 = scmp.ne.s32.totalorder (!%p1060_p8), %s1270_s8, 0 }
  0x67   : > { %942 = dma.done.wait (%p1277_p4), %s282_s18, 128  }
  0x68   : > { %944 = vsyncadd (%p1277_p4), %s282_s18, 4294967168  ;;  %p1278_p5 = scmp.eq.s32.totalorder %s1041_s6, 0 }
  0x6a   : > { %946 = dma.done.wait (%p1278_p5), [#allocation7], 1280   ;;  %p1279_p11 = pmov %p1278_p5 }
  0x6b   : > { %v974_v0 = vmov 0.0   ;;  %vm975_vm0 = vmmov 0   ;;  %v797_v1 = vld [vmem:[#allocation6] sm:$0xff]   ;;  %v798_v2 = vld [vmem:[#allocation6 + $0x8] sm:$0xff]   ;;  %v324_v3 = vld [vmem:[%s285_s15] sm:$0xff]  ;;  %vm349_vm1 = vcmask 261120   ;;  %v551_v50 = vlaneseq }
  0x6c   : > { %948 = vsyncadd (%p1279_p11), [#allocation7], 4294966016  ;;  %698 = vmatprep.subr.bf16.mxu0 %v974_v0  ;;  %702 = vmatprep.mubr.msk.bf16.mxu0 %vm975_vm0, %v974_v0  ;;  %v325_v4 = vpack.c.bf16 %v324_v3, %v324_v3  ;;  %v669_v5 = vld [vmem:[%s1261_s2] ss:$0 sm:$0xff]  ;;  %v800_v12 = vld [vmem:[#allocation8 + $0x8] sm:$0xff]   ;;  %s544_s24 = sld [smem:[#allocation2]] }
  0x6d   : > { %706 = vmatprep.subr.bf16.mxu1 %v974_v0  ;;  %722 = vmatprep.mubr.msk.bf16.mxu1 %vm975_vm0, %v974_v0  ;;  %v799_v11 = vld [vmem:[#allocation8] sm:$0xff]   ;;  %v801_v13 = vld [vmem:[#allocation8 + $0x10] sm:$0xff]   ;;  %v802_v18 = vld [vmem:[#allocation8 + $0x18] sm:$0xff]   ;;  %v552_v52 = vand.u32 127, %v551_v50  ;;  %v554_v53 = vshrl.u32 %v551_v50, 7  ;;  %s683_s17 = sshll.u32 %s1041_s6, 4 }
  0x6e   : > { %699 = vmatpush3.bf16.msra.mxu0 %v797_v1  ;;  %707 = vmatpush3.bf16.msra.mxu1 %v799_v11  ;;  %v803_v19 = vld [vmem:[#allocation8 + $0x20] sm:$0xff]   ;;  %v804_v20 = vld [vmem:[#allocation8 + $0x28] sm:$0xff]   ;;  %v805_v21 = vld [vmem:[#allocation8 + $0x30] sm:$0xff]   ;;  %s322_s25 = scalar_lea.vmem [#allocation9], %s1189_s23  ;;  %vm558_vm5 = vcmask 57344   ;;  %s1215_s18 = scalar_lea.hbm %s1266_s7, %s683_s17 }
  0x6f   : > { %700 = vmatprep.subr.bf16.mxu0 %v974_v0  ;;  %708 = vmatprep.subr.bf16.mxu1 %v974_v0  ;;  %v806_v22 = vld [vmem:[#allocation8 + $0x38] sm:$0xff]   ;;  %v673_v31 = vld [vmem:[%s1263_s4] ss:$0 sm:$0xff]  ;;  %v555_v56 = vsub.s32 %v552_v52, %v554_v53  ;;  %s573_s20 = sshll.u32 %s322_s25, 4  ;;  %s561_s15 = scalar_lea.sflag [#allocation5], %s1189_s23  ;;  %s1217_s20 = int_to_ptr.vmem [resolvable:$true] %s573_s20 }
  0x70   : > { %v682_v47 = vld [vmem:[%s1264_s5] ss:$0 sm:$0xff]  ;;  %s897_s8 = scalar_lea.vmem %s1217_s20, 16  ;;  %p1280_p0 = scmp.ne.s32.totalorder %s1275_s14, 0 }
  0x71   : > { %p898_p8 = scmp.ne.s32.totalorder %s1217_s20, %s897_s8  ;;  %s976_s6 = smov [#allocation9]  }
  0x72   : > { %701 = vmatpush3.bf16.msra.mxu0 %v798_v2  ;;  %709 = vmatpush3.bf16.msra.mxu1 %v800_v12  ;;  %v545_v51 = vstv %s544_s24  ;;  %s901_s10 = sshll.u32 %s976_s6, 4  ;;  %s902_s10 = int_to_ptr.vmem [resolvable:$false] %s901_s10 }
  0x73   : > { %710 = vmatprep.subr.bf16.mxu1 %v974_v0  ;;  %p899_p1 = pnand %p898_p8, %p1280_p0  ;;  %s903_s19 = scalar_lea.vmem %s902_s10, 32 }
  0x74   : > { %p904_p7 = scmp.lt.s32.totalorder %s1217_s20, %s902_s10  ;;  %p905_p9 = scmp.lt.s32.totalorder %s903_s19, %s897_s8 }
  0x75   : > { %703 = vmatmul.mubr.msk.bf16.vlgmr.msra.gmra.mrb[0].mxu0 %vm349_vm1, %v325_v4  ;;  %p900_p3 = pneg %p899_p1 }
  0x76   : > { %711 = vmatpush3.bf16.msra.mxu1 %v801_v13  ;;  %p906_p12 = por %p905_p9, %p904_p7 }
  0x77   : > { %712 = vmatprep.subr.bf16.mxu1 %v974_v0 }
  0x78   : > { %p907_p2 = pnand %p906_p12, %p900_p3 }
  0x7a   : > { %713 = vmatpush3.bf16.msra.mxu1 %v802_v18 }
  0x7b   : > { %714 = vmatprep.subr.bf16.mxu1 %v974_v0 }
  0x7e   : > { %715 = vmatpush3.bf16.msra.mxu1 %v803_v19 }
  0x7f   : > { %716 = vmatprep.subr.bf16.mxu1 %v974_v0 }
  0x82   : > { %717 = vmatpush3.bf16.msra.mxu1 %v804_v20 }
  0x83   : > { %718 = vmatprep.subr.bf16.mxu1 %v974_v0 }
  0x86   : > { %719 = vmatpush3.bf16.msra.mxu1 %v805_v21 }
  0x87   : > { %720 = vmatprep.subr.bf16.mxu1 %v974_v0 }
  0x8a   : > { %721 = vmatpush3.bf16.msra.mxu1 %v806_v22 }
 0x148   : > { %v387_v6 = vpop.f32.mrb[0].mxu0 }
 0x149   : > { %v388_v7 = vadd.f32 %v669_v5, %v387_v6  ;;  %v704_v8 = vpop.f32.mrb[1].mxu0 }
 0x14a   : > { %v390_v9 = vpop.f32.mrb[2].mxu0 }
 0x14b   : > { %393 = vadd.xlane.f32.xlu0 %v388_v7  ;;  %v705_v10 = vpop.f32.mrb[3].mxu0 }
 0x1d8   : > { %v394_v14 = vpop.xlane.xlu0 %393 }
 0x1d9   : > { %v396_v15 = vmul.f32 0.0078125, %v394_v14 }
 0x1db   : > { %v397_v16 = vsub.f32 %v388_v7, %v396_v15 }
 0x1dd   : > { %v398_v17 = vmul.f32 %v397_v16, %v397_v16 }
 0x1df   : > { %399 = vadd.xlane.f32.xlu0 %v398_v17 }
 0x26c   : > { %v400_v23 = vpop.xlane.xlu0 %399 }
 0x26d   : > { %v401_v24 = vmul.f32 0.0078125, %v400_v23 }
 0x26f   : > { %v402_v25 = vadd.f32 1e-05, %v401_v24 }
 0x271   : > { %807 = vrsqrt.f32 %v402_v25 }
 0x27b   : > { %v808_v26 = vpop.eup %807 }
 0x27c   : > { %v404_v27 = vmul.f32 %v808_v26, %v397_v16 }
 0x27e   : > { %vm405_vm2 = vcmp.ge.f32.partialorder %v404_v27, 0.0  ;;  %v406_v28 = vmul.f32 0.01, %v404_v27 }
 0x280   : > { %v407_v29 = vsel %vm405_vm2, %v404_v27, %v406_v28 }
 0x281   : > { %v408_v30 = vpack.c.bf16 %v407_v29, %v407_v29 }
 0x283   : > { %723 = vmatmul.mubr.bf16.vlgmr.msra.gmra.mrb[0].mxu1 %v408_v30 }
 0x356   : > { %v514_v32 = vpop.f32.mrb[0].mxu1 }
 0x357   : > { %v515_v33 = vadd.f32 %v673_v31, %v514_v32  ;;  %v724_v34 = vpop.f32.mrb[1].mxu1 }
 0x358   : > { %v517_v35 = vpop.f32.mrb[2].mxu1 }
 0x359   : > { %520 = vadd.xlane.f32.xlu1 %v515_v33  ;;  %v725_v36 = vpop.f32.mrb[3].mxu1 }
 0x3e6   : > { %v521_v37 = vpop.xlane.xlu1 %520 }
 0x3e7   : > { %v522_v38 = vmul.f32 0.0078125, %v521_v37 }
 0x3e9   : > { %v523_v39 = vsub.f32 %v515_v33, %v522_v38 }
 0x3eb   : > { %v524_v40 = vmul.f32 %v523_v39, %v523_v39 }
 0x3ed   : > { %525 = vadd.xlane.f32.xlu1 %v524_v40 }
 0x47a   : > { %v526_v41 = vpop.xlane.xlu1 %525 }
 0x47b   : > { %v527_v42 = vmul.f32 0.0078125, %v526_v41 }
 0x47d   : > { %v528_v43 = vadd.f32 1e-05, %v527_v42 }
 0x47f   : > { %809 = vrsqrt.f32 %v528_v43 }
 0x489   : > { %v810_v44 = vpop.eup %809 }
 0x48a   : > { %v530_v45 = vmul.f32 %v810_v44, %v523_v39 }
 0x48c   : > { %vm531_vm3 = vcmp.ge.f32.partialorder %v530_v45, 0.0  ;;  %v532_v46 = vmul.f32 0.01, %v530_v45 }
 0x48e   : > { %v533_v48 = vsel %vm531_vm3, %v530_v45, %v532_v46 }
 0x48f   : > { %v541_v49 = vmul.f32 %v682_v47, %v533_v48 }
 0x491   : > { %542 = vadd.xlane.f32.xlu0 %v541_v49 }
 0x51e   : > { %v543_v54 = vpop.xlane.xlu0 %542 }
 0x51f   : > { %v546_v55 = vadd.f32 %v545_v51, %v543_v54 }
 0x521   : > { %vm547_vm4 = vcmp.ge.f32.partialorder %v546_v55, 0.0  ;;  %v548_v57 = vmul.f32 0.01, %v546_v55 }
 0x523   : > { %v549_v58 = vsel %vm547_vm4, %v546_v55, %v548_v57 }
 0x524   : > { %v556_v59 = vrot.slane %v549_v58, %v555_v56 }
 0x526   : > { %559 = vst.msk [vmem:[%s322_s25] sm:$0x1] %vm558_vm5, %v556_v59 }
 0x527   : > { %910 = shalt.err (!%p907_p2)
}
 0x528   : > { %s911_s23 = scalar_lea.hbm %s1215_s18, 16  ;;  %s915_s22 = scalar_lea.hbm %s1266_s7, 32 }
 0x529   : > { %p912_p13 = scmp.ne.s32.totalorder %s1215_s18, %s911_s23  ;;  %p916_p4 = scmp.lt.u32.totalorder %s1215_s18, %s1266_s7 }
 0x52a   : > { %p917_p5 = scmp.lt.u32.totalorder %s915_s22, %s911_s23  ;;  %p919_p8 = scmp.lt.u32.totalorder %s911_s23, %s1215_s18 }
 0x52b   : > { %p913_p6 = pnand %p912_p13, %p1280_p0 }
 0x52c   : > { %p918_p11 = por %p917_p5, %p916_p4 }
 0x52d   : > { %p914_p10 = pneg %p913_p6 }
 0x52e   : > { %p920_p1 = por %p919_p8, %p918_p11 }
 0x530   : > { %p921_p3 = pnand %p920_p1, %p914_p10 }
 0x532   : > { %924 = shalt.err (!%p921_p3)
}
 0x533   : > { %736 = dma.vmem_to_hbm [thread:$0]  (%p1280_p0), %s1217_s20, 16, %s1215_s18, %s561_s15  }
 0x534 PF: > { %s585_s25 = sand.u32 1, %s955_s26   ;;  %p1281_p7 = scmp.ne.s32.totalorder %s1271_s9, 0 }
 0x535   : > { %p1282_p9 = scmp.ge.s32.totalorder %s967_s29, 2  ;;  %s586_s13 = scalar_lea.sflag [#allocation5], %s585_s25 }
 0x537   : > { %p750_p12 = pnand %p1282_p9, %p1281_p7 }
 0x539   : > { %950 = dma.done.wait (!%p750_p12), %s586_s13, 16  }
 0x53a   : > { %952 = vsyncadd (!%p750_p12), %s586_s13, 4294967280  ;;  %p22_p2 = scmp.ge.s32.totalorder %s1130_s30, 4   ;;  %s1283_s26 = smov %s959_s27 }
 0x53b   : > { %s1284_s27 = smov %s963_s28  ;;  %s1285_s28 = smov %s1146_s16 }
 0x53c   : > { %s1286_s29 = smov %s1130_s30  ;;  %24 = sbr.rel (!%p22_p2) target bundleno = 8 (0x8), region = 101 }
 0x543   :  { %590 = vsyncpa [#allocation4], 1 }
 0x544   :  { %592 = vsyncpa [#allocation4 + $0x1], 1 }
 0x545   :  { %593 = vsyncpa [#allocation7], 1 }
 0x546   :  { %594 = vsyncpa [#allocation5], 1 }
 0x547   :  { %596 = vsyncpa [#allocation5 + $0x1], 1 }

</bundles_post_ra>
